<compile_context>
chip_gen: v7x
topology: tpu7x:2x2x1
jax: 0.10.0
libtpu: 0.0.40
codegen_flags: <defaults>
</compile_context>

<pallas_src>
import functools
from typing import NamedTuple

import jax
import jax.numpy as jnp
from jax.experimental import pallas as pl
from jax.experimental.pallas import tpu as pltpu


def _round_up(x, m):
    return (x + m - 1) // m * m


def _cdiv(a, b):
    return -(-a // b)


def _split_dim(size, unit, max_tile):
    """size, max_tile are multiples of `unit`. Near-even split -> (tile, padded_size, n)."""
    if size <= max_tile:
        return size, size, 1
    n = _cdiv(size, max_tile)
    tile = _round_up(_cdiv(size, n), unit)
    return tile, tile * n, n


def _tpu_generation_defaults():
    """Per-generation tile caps and VMEM limits (double-buffer safe)."""
    try:
        kind = jax.devices()[0].device_kind.lower()
    except Exception:
        kind = ""
    if "v7" in kind:
        # v7x: 64 MiB physical VMEM, 2 TensorCores per chip.
        return dict(max_tb=512, max_tc=1024, max_tk=1024,
                    vmem_limit=32 * 1024 * 1024, want_two_parallel_steps=True)
    # v5e / v6e: 128 MiB physical VMEM -> larger tiles amortize per-grid-step overhead.
    return dict(max_tb=1024, max_tc=2048, max_tk=1024,
                vmem_limit=64 * 1024 * 1024, want_two_parallel_steps=False)


class MetabolicMeta(NamedTuple):
    phys_dim: int
    chem_dim: int
    c_pad: int
    tc: int
    nc: int
    k_pad: int
    tk: int
    nk: int
    max_tb: int
    vmem_limit: int
    two_parallel_steps: bool
    out_dtype: object  # keep jnp.float32 for 1e-5 parity; jnp.bfloat16 halves store bytes


def prepare_params(params, *, out_dtype=jnp.float32):
    """One-time, parameter-side prep (hoisted out of the per-call path)."""
    cfg = _tpu_generation_defaults()
    w = params["w_phys"].astype(jnp.float32)                          # (P, C)
    P, C = w.shape

    # Lane-dense C: pad to a 128 multiple, near-even tiling (no over-rounding).
    c_pad0 = _round_up(C, 128)
    tc, C_pad, nc = _split_dim(c_pad0, 128, cfg["max_tc"])

    # K-reduction tiling only when full-K operands would pressure VMEM.
    kr = _round_up(P, 128)
    if kr > cfg["max_tk"]:
        tk, K_pad, nk = _split_dim(kr, 128, cfg["max_tk"])
    else:
        tk, K_pad, nk = P, P, 1          # full-extent K block: no K padding needed at all

    w = jnp.pad(w, ((0, K_pad - P), (0, C_pad - C)))                  # (K_pad, C_pad)
    w_surprise = jnp.pad(params["w_surprise"].astype(jnp.float32),
                         ((0, 0), (0, C_pad - C)))                    # (1, C_pad)
    fused_bias = jnp.pad((params["b_phys"] + params["b_surprise"]
                          + params["chem_baseline"]).astype(jnp.float32),
                         ((0, 0), (0, C_pad - C)))                    # (1, C_pad)

    prepared = {"w": w, "w_surprise": w_surprise, "bias": fused_bias}
    meta = MetabolicMeta(
        phys_dim=P, chem_dim=C, c_pad=C_pad, tc=tc, nc=nc,
        k_pad=K_pad, tk=tk, nk=nk,
        max_tb=cfg["max_tb"], vmem_limit=cfg["vmem_limit"],
        two_parallel_steps=cfg["want_two_parallel_steps"],
        out_dtype=out_dtype)
    return prepared, meta


def _metabolic_kernel(err_ref, s_ref, w_ref, ws_ref, b_ref, out_ref):
    # Single-K-block path: one MXU dot + rank-1 surprise update (VPU) + fused bias + tanh (EUP).
    drive = jnp.dot(err_ref[...], w_ref[...], preferred_element_type=jnp.float32)
    drive += s_ref[...] * ws_ref[...]              # (tb,1) * (1,tc) broadcast
    out_ref[...] = jnp.tanh(drive + b_ref[...]).astype(out_ref.dtype)


def _metabolic_kernel_ksplit(err_ref, s_ref, w_ref, ws_ref, b_ref, out_ref, acc_ref):
    k = pl.program_id(2)

    @pl.when(k == 0)
    def _():
        acc_ref[...] = jnp.zeros_like(acc_ref)

    acc_ref[...] += jnp.dot(err_ref[...], w_ref[...], preferred_element_type=jnp.float32)

    @pl.when(k == pl.num_programs(2) - 1)
    def _():
        drive = acc_ref[...] + s_ref[...] * ws_ref[...] + b_ref[...]
        out_ref[...] = jnp.tanh(drive).astype(out_ref.dtype)


@functools.partial(jax.jit, static_argnames=("meta",))
def metabolic_core_forward(surprise, homeostatic_error, prepared, meta):
    """surprise: (B,), homeostatic_error: (B, P) -> s_chem: (B, C)."""
    err = homeostatic_error.astype(jnp.float32)
    B, P = err.shape
    assert P == meta.phys_dim
    surp = surprise.astype(jnp.float32).reshape(B, 1)

    # --- batch tiling (shape-static under jit) ---
    tb, B_pad, nb = _split_dim(_round_up(B, 8), 8, meta.max_tb)
    tc, nc, C_pad = meta.tc, meta.nc, meta.c_pad

    # v7x: keep both TensorCores busy when a single tile would cover everything.
    if meta.two_parallel_steps and nb * nc == 1:
        if B_pad >= 16:
            nb = 2
            tb = _round_up(_cdiv(B_pad, 2), 8)
            B_pad = nb * tb
        elif C_pad % 256 == 0:
            nc, tc = 2, C_pad // 2

    # --- per-call activation padding, only when actually needed ---
    if B_pad != B or meta.k_pad != P:
        err = jnp.pad(err, ((0, B_pad - B), (0, meta.k_pad - P)))
    if B_pad != B:
        surp = jnp.pad(surp, ((0, B_pad - B), (0, 0)))

    # --- grid ordering: keep the larger operand resident across the inner axis ---
    w_bytes = meta.k_pad * C_pad
    a_bytes = B_pad * meta.k_pad
    b_outer = (nb - 1) * w_bytes <= (nc - 1) * a_bytes

    if meta.nk == 1:
        kernel = _metabolic_kernel
        scratch = ()
        err_block, w_block = (tb, meta.k_pad), (meta.k_pad, tc)
        if b_outer:
            grid = (nb, nc)
            err_map = lambda i, j: (i, 0)
            s_map = lambda i, j: (i, 0)
            w_map = lambda i, j: (0, j)
            c_map = lambda i, j: (0, j)
            out_map = lambda i, j: (i, j)
        else:
            grid = (nc, nb)
            err_map = lambda j, i: (i, 0)
            s_map = lambda j, i: (i, 0)
            w_map = lambda j, i: (0, j)
            c_map = lambda j, i: (0, j)
            out_map = lambda j, i: (i, j)
        semantics = ("parallel", "parallel")
    else:
        kernel = _metabolic_kernel_ksplit
        scratch = (pltpu.VMEM((tb, tc), jnp.float32),)
        err_block, w_block = (tb, meta.tk), (meta.tk, tc)
        if b_outer:
            grid = (nb, nc, meta.nk)
            err_map = lambda i, j, k: (i, k)
            s_map = lambda i, j, k: (i, 0)
            w_map = lambda i, j, k: (k, j)
            c_map = lambda i, j, k: (0, j)
            out_map = lambda i, j, k: (i, j)
        else:
            grid = (nc, nb, meta.nk)
            err_map = lambda j, i, k: (i, k)
            s_map = lambda j, i, k: (i, 0)
            w_map = lambda j, i, k: (k, j)
            c_map = lambda j, i, k: (0, j)
            out_map = lambda j, i, k: (i, j)
        semantics = ("parallel", "parallel", "arbitrary")

    out = pl.pallas_call(
        kernel,
        out_shape=jax.ShapeDtypeStruct((B_pad, C_pad), meta.out_dtype),
        grid=grid,
        in_specs=[
            pl.BlockSpec(err_block, err_map),   # homeostatic error tile
            pl.BlockSpec((tb, 1), s_map),       # surprise column
            pl.BlockSpec(w_block, w_map),       # phys-projection weights
            pl.BlockSpec((1, tc), c_map),       # surprise-projection weights
            pl.BlockSpec((1, tc), c_map),       # fused bias (b_phys + b_surprise + baseline)
        ],
        out_specs=pl.BlockSpec((tb, tc), out_map),
        scratch_shapes=scratch,
        compiler_params=pltpu.CompilerParams(
            dimension_semantics=semantics,
            vmem_limit_bytes=meta.vmem_limit,
        ),
    )(err, surp, prepared["w"], prepared["w_surprise"], prepared["bias"])

    if B_pad != B or C_pad != meta.chem_dim:
        # Fused into the jitted graph; skipped entirely when shapes are already aligned.
        out = out[:B, :meta.chem_dim]
    return out


def init_params(key, chem_dim, phys_dim):
    """Deterministic init mirroring nn.Linear's U(-1/sqrt(fan_in), 1/sqrt(fan_in))."""
    k1, k2, k3, k4 = jax.random.split(key, 4)
    bound_phys = 1.0 / jnp.sqrt(phys_dim)
    bound_surp = 1.0  # fan_in = 1 for surprise_proj
    return {
        "w_phys": jax.random.uniform(k1, (phys_dim, chem_dim), jnp.float32,
                                     -bound_phys, bound_phys),
        "b_phys": jax.random.uniform(k2, (1, chem_dim), jnp.float32,
                                     -bound_phys, bound_phys),
        "w_surprise": jax.random.uniform(k3, (1, chem_dim), jnp.float32,
                                         -bound_surp, bound_surp),
        "b_surprise": jax.random.uniform(k4, (1, chem_dim), jnp.float32,
                                         -bound_surp, bound_surp),
        "chem_baseline": jnp.zeros((1, chem_dim), jnp.float32),
    }


def reference_forward(surprise, homeostatic_error, params):
    drive_phys = homeostatic_error @ params["w_phys"] + params["b_phys"]
    drive_surp = surprise[:, None] * params["w_surprise"] + params["b_surprise"]
    return jnp.tanh(params["chem_baseline"] + drive_phys + drive_surp)


def compute_homeostatic_loss(s_phys, target_phys_state):
    # Plain-JAX glue: MSE loss (scalar reduction; not on the kernel hot path).
    return jnp.mean((s_phys - target_phys_state) ** 2)


if __name__ == "__main__":
    B, P, C = 2, 4, 32  # batch, phys_dim, chem_dim

    key = jax.random.PRNGKey(0)
    k_params, k_surprise, k_err = jax.random.split(key, 3)

    params = init_params(k_params, chem_dim=C, phys_dim=P)
    prepared, meta = prepare_params(params)   # one-time weight-side prep (hoisted)

    surprise = jax.random.normal(k_surprise, (B,), jnp.float32)
    homeostatic_error = jax.random.normal(k_err, (B, P), jnp.float32)

    s_chem = metabolic_core_forward(surprise, homeostatic_error, prepared, meta)
    s_chem = jax.block_until_ready(s_chem)

    ref = reference_forward(surprise, homeostatic_error, params)
    assert s_chem.shape == (B, C)
    assert jnp.allclose(s_chem, ref, atol=1e-5, rtol=1e-5)

    print("KERNEL_OK")
</pallas_src>

<mosaic_0001>
module attributes {stable_mosaic.version = 11 : i64} {
  func.func @_metabolic_kernel(%arg0: i32, %arg1: i32, %arg2: memref<8x4xf32, #tpu.memory_space<vmem>>, %arg3: memref<8x1xf32, #tpu.memory_space<vmem>>, %arg4: memref<4x128xf32, #tpu.memory_space<vmem>>, %arg5: memref<1x128xf32, #tpu.memory_space<vmem>>, %arg6: memref<1x128xf32, #tpu.memory_space<vmem>>, %arg7: memref<8x128xf32, #tpu.memory_space<vmem>>) attributes {dimension_semantics = [#tpu.dimension_semantics<parallel>, #tpu.dimension_semantics<parallel>], iteration_bounds = array<i64: 1, 1>, scalar_prefetch = 0 : i64, scratch_operands = 0 : i64, tpu.core_type = #tpu.core_type<tc>, window_params = [{transform_indices = @transform_0, window_bounds = array<i64: 8, 4>}, {transform_indices = @transform_1, window_bounds = array<i64: 8, 1>}, {transform_indices = @transform_2, window_bounds = array<i64: 4, 128>}, {transform_indices = @transform_3, window_bounds = array<i64: 1, 128>}, {transform_indices = @transform_4, window_bounds = array<i64: 1, 128>}, {transform_indices = @transform_5, window_bounds = array<i64: 8, 128>}]} {
    %c0 = arith.constant 0 : index
    %c0_0 = arith.constant 0 : index
    %0 = vector.load %arg2[%c0, %c0_0] : memref<8x4xf32, #tpu.memory_space<vmem>>, vector<8x4xf32>
    %c0_1 = arith.constant 0 : index
    %c0_2 = arith.constant 0 : index
    %1 = vector.load %arg4[%c0_1, %c0_2] : memref<4x128xf32, #tpu.memory_space<vmem>>, vector<4x128xf32>
    %cst = arith.constant dense<0.000000e+00> : vector<8x128xf32>
    %2 = tpu.matmul %0, %1, %cst {dimension_numbers = #tpu.dot_dimension_numbers<[1], [0], [0], [1], [0, 0, 1, 1], [], []>} : vector<8x4xf32>, vector<4x128xf32>, vector<8x128xf32> -> vector<8x128xf32>
    %c0_3 = arith.constant 0 : index
    %c0_4 = arith.constant 0 : index
    %3 = vector.load %arg3[%c0_3, %c0_4] : memref<8x1xf32, #tpu.memory_space<vmem>>, vector<8x1xf32>
    %c0_5 = arith.constant 0 : index
    %c0_6 = arith.constant 0 : index
    %4 = vector.load %arg5[%c0_5, %c0_6] : memref<1x128xf32, #tpu.memory_space<vmem>>, vector<1x128xf32>
    %5 = vector.broadcast %3 : vector<8x1xf32> to vector<8x128xf32>
    %6 = vector.broadcast %4 : vector<1x128xf32> to vector<8x128xf32>
    %7 = arith.mulf %5, %6 : vector<8x128xf32>
    %8 = arith.addf %2, %7 : vector<8x128xf32>
    %c0_7 = arith.constant 0 : index
    %c0_8 = arith.constant 0 : index
    %9 = vector.load %arg6[%c0_7, %c0_8] : memref<1x128xf32, #tpu.memory_space<vmem>>, vector<1x128xf32>
    %10 = vector.broadcast %9 : vector<1x128xf32> to vector<8x128xf32>
    %11 = arith.addf %8, %10 : vector<8x128xf32>
    %12 = math.tanh %11 : vector<8x128xf32>
    %c0_9 = arith.constant 0 : index
    %c0_10 = arith.constant 0 : index
    %13 = vector.load %arg7[%c0_9, %c0_10] : memref<8x128xf32, #tpu.memory_space<vmem>>, vector<8x128xf32>
    tpu.vector_store %arg7[%c0_9, %c0_10], %12 {strides = array<i32>} : memref<8x128xf32, #tpu.memory_space<vmem>>, vector<8x128xf32>,
    return
  }
  func.func @transform_0(%arg0: i32, %arg1: i32) -> (i32, i32) {
    %c0_i32 = arith.constant 0 : i32
    %c0_i32_0 = arith.constant 0 : i32
    return %arg0, %c0_i32 : i32, i32
  }
  func.func @transform_1(%arg0: i32, %arg1: i32) -> (i32, i32) {
    %c0_i32 = arith.constant 0 : i32
    %c0_i32_0 = arith.constant 0 : i32
    return %arg0, %c0_i32 : i32, i32
  }
  func.func @transform_2(%arg0: i32, %arg1: i32) -> (i32, i32) {
    %c0_i32 = arith.constant 0 : i32
    %c0_i32_0 = arith.constant 0 : i32
    return %c0_i32, %arg1 : i32, i32
  }
  func.func @transform_3(%arg0: i32, %arg1: i32) -> (i32, i32) {
    %c0_i32 = arith.constant 0 : i32
    %c0_i32_0 = arith.constant 0 : i32
    return %c0_i32, %arg1 : i32, i32
  }
  func.func @transform_4(%arg0: i32, %arg1: i32) -> (i32, i32) {
    %c0_i32 = arith.constant 0 : i32
    %c0_i32_0 = arith.constant 0 : i32
    return %c0_i32, %arg1 : i32, i32
  }
  func.func @transform_5(%arg0: i32, %arg1: i32) -> (i32, i32) {
    %c0_i32 = arith.constant 0 : i32
    return %arg0, %arg1 : i32, i32
  }
}

</mosaic_0001>

<bundles_post_ra>
// kernel: metabolic_core_forward.1
= control target key start
LH: loop header
LB: loop body
LE: loop exit
PB: predicated region body
PF: predicated region fallthrough
CT: control target
= control target key end

     0   :  { %10 = vsyncpa [#allocation3], 0  ;;  %s474_s0 = inlined_call_operand.hbm [shape: f32[8,4], index: 0, kind: input, shape index: {}]   ;;  %s475_s1 = inlined_call_operand.hbm [shape: f32[8,1], index: 1, kind: input, shape index: {}]   ;;  %s476_s2 = inlined_call_operand.hbm [shape: f32[4,128], index: 2, kind: input, shape index: {}]   ;;  %s477_s3 = inlined_call_operand.hbm [shape: f32[1,128], index: 3, kind: input, shape index: {}]   ;;  %s478_s4 = inlined_call_operand.hbm [shape: f32[1,128], index: 4, kind: input, shape index: {}]   ;;  %s479_s5 = inlined_call_operand.hbm [shape: f32[8,128], index: 5, kind: output, shape index: {}]  }
   0x1   :  { %11 = vsyncpa [#allocation6], 0 }
   0x2   :  { %12 = vsyncpa [#allocation9], 0 }
   0x3   :  { %13 = vsyncpa [#allocation4], 0  ;;  %s363_s18 = smov [#allocation5]   ;;  %s364_s20 = smov [#allocation8]  }
   0x4   :  { %s30_s19 = sshll.u32 %s363_s18, 4  ;;  %s50_s21 = sshll.u32 %s364_s20, 4  ;;  %s31_s19 = int_to_ptr.vmem [resolvable:$true] %s30_s19  ;;  %s51_s21 = int_to_ptr.vmem [resolvable:$true] %s50_s21 }
   0x5   :  { %s223_s24 = scalar_lea.hbm %s475_s1, 128 }
   0x6   :  { %p224_p0 = scmp.ne.s32.totalorder %s475_s1, %s223_s24  ;;  %p227_p1 = scmp.lt.u32.totalorder %s223_s24, %s475_s1 }
   0x8   :  { %p229_p2 = pnand %p227_p1, %p224_p0 }
   0xa   :  { %232 = shalt.err (!%p229_p2)
}
   0xb   :  { %s233_s29 = scalar_lea.vmem %s31_s19, 128  ;;  %p238_p4 = scmp.lt.s32.totalorder %s31_s19, %s31_s19 }
   0xc   :  { %p234_p3 = scmp.ne.s32.totalorder %s31_s19, %s233_s29  ;;  %p239_p5 = scmp.lt.s32.totalorder %s233_s29, %s233_s29 }
   0xe   :  { %p240_p6 = por %p239_p5, %p238_p4 }
  0x10   :  { %p241_p7 = pnand %p240_p6, %p234_p3 }
  0x12   :  { %244 = shalt.err (!%p241_p7)
}
  0x13   :  { %33 = dma.hbm_to_vmem [thread:$0]  %s475_s1, 128, %s31_s19, [#allocation6]  }
  0x14   :  { %s245_s9 = scalar_lea.hbm %s477_s3, 16 }
  0x15   :  { %p246_p8 = scmp.ne.s32.totalorder %s477_s3, %s245_s9  ;;  %p249_p9 = scmp.lt.u32.totalorder %s245_s9, %s477_s3 }
  0x17   :  { %p251_p10 = pnand %p249_p9, %p246_p8 }
  0x19   :  { %254 = shalt.err (!%p251_p10)
}
  0x1a   :  { %s255_s14 = scalar_lea.vmem %s51_s21, 16  ;;  %s259_s15 = scalar_lea.vmem %s51_s21, 32 }
  0x1b   :  { %p256_p11 = scmp.ne.s32.totalorder %s51_s21, %s255_s14  ;;  %p260_p12 = scmp.lt.s32.totalorder %s51_s21, %s51_s21 }
  0x1c   :  { %p261_p13 = scmp.lt.s32.totalorder %s259_s15, %s255_s14 }
  0x1e   :  { %p262_p0 = por %p261_p13, %p260_p12 }
  0x20   :  { %p263_p1 = pnand %p262_p0, %p256_p11 }
  0x22   :  { %266 = shalt.err (!%p263_p1)
}
  0x23   :  { %53 = dma.hbm_to_vmem [thread:$0]  %s477_s3, 16, %s51_s21, [#allocation9]  }
  0x24   :  { %s365_s17 = smov [#allocation2]   ;;  %s366_s19 = smov [#allocation7]  }
  0x25   :  { %s20_s18 = sshll.u32 %s365_s17, 4  ;;  %s40_s20 = sshll.u32 %s366_s19, 4  ;;  %s21_s18 = int_to_ptr.vmem [resolvable:$true] %s20_s18  ;;  %s41_s20 = int_to_ptr.vmem [resolvable:$true] %s40_s20 }
  0x26   :  { %s267_s24 = scalar_lea.hbm %s474_s0, 128 }
  0x27   :  { %p268_p2 = scmp.ne.s32.totalorder %s474_s0, %s267_s24  ;;  %p271_p3 = scmp.lt.u32.totalorder %s267_s24, %s474_s0 }
  0x29   :  { %p273_p4 = pnand %p271_p3, %p268_p2 }
  0x2b   :  { %276 = shalt.err (!%p273_p4)
}
  0x2c   :  { %s277_s3 = scalar_lea.vmem %s21_s18, 128  ;;  %p282_p6 = scmp.lt.s32.totalorder %s21_s18, %s21_s18 }
  0x2d   :  { %p278_p5 = scmp.ne.s32.totalorder %s21_s18, %s277_s3  ;;  %p283_p7 = scmp.lt.s32.totalorder %s277_s3, %s277_s3 }
  0x2f   :  { %p284_p8 = por %p283_p7, %p282_p6 }
  0x31   :  { %p285_p9 = pnand %p284_p8, %p278_p5 }
  0x33   :  { %288 = shalt.err (!%p285_p9)
}
  0x34   :  { %23 = dma.hbm_to_vmem [thread:$0]  %s474_s0, 128, %s21_s18, [#allocation3]  }
  0x35   :  { %s289_s7 = scalar_lea.hbm %s476_s2, 64 }
  0x36   :  { %p290_p10 = scmp.ne.s32.totalorder %s476_s2, %s289_s7  ;;  %p293_p11 = scmp.lt.u32.totalorder %s289_s7, %s476_s2 }
  0x38   :  { %p295_p12 = pnand %p293_p11, %p290_p10 }
  0x3a   :  { %298 = shalt.err (!%p295_p12)
}
  0x3b   :  { %s299_s12 = scalar_lea.vmem %s41_s20, 64  ;;  %p304_p0 = scmp.lt.s32.totalorder %s41_s20, %s41_s20 }
  0x3c   :  { %p300_p13 = scmp.ne.s32.totalorder %s41_s20, %s299_s12  ;;  %p305_p1 = scmp.lt.s32.totalorder %s299_s12, %s299_s12 }
  0x3e   :  { %p306_p2 = por %p305_p1, %p304_p0 }
  0x40   :  { %p307_p3 = pnand %p306_p2, %p300_p13 }
  0x42   :  { %310 = shalt.err (!%p307_p3)
}
  0x43   :  { %43 = dma.hbm_to_vmem [thread:$0]  %s476_s2, 64, %s41_s20, [#allocation6]  }
  0x44   :  { %s367_s14 = smov [#allocation10]   ;;  %s311_s17 = scalar_lea.hbm %s478_s4, 16 }
  0x45   :  { %s60_s15 = sshll.u32 %s367_s14, 4  ;;  %p312_p4 = scmp.ne.s32.totalorder %s478_s4, %s311_s17  ;;  %s61_s15 = int_to_ptr.vmem [resolvable:$true] %s60_s15 }
  0x46   :  { %p315_p5 = scmp.lt.u32.totalorder %s311_s17, %s478_s4 }
  0x48   :  { %p317_p6 = pnand %p315_p5, %p312_p4 }
  0x4a   :  { %320 = shalt.err (!%p317_p6)
}
  0x4b   :  { %s321_s24 = scalar_lea.vmem %s61_s15, 16  ;;  %s325_s2 = scalar_lea.vmem %s61_s15, 32 }
  0x4c   :  { %p322_p7 = scmp.ne.s32.totalorder %s61_s15, %s321_s24  ;;  %p326_p8 = scmp.lt.s32.totalorder %s61_s15, %s61_s15 }
  0x4d   :  { %p327_p9 = scmp.lt.s32.totalorder %s325_s2, %s321_s24 }
  0x4f   :  { %p328_p10 = por %p327_p9, %p326_p8 }
  0x51   :  { %p329_p11 = pnand %p328_p10, %p322_p7 }
  0x53   :  { %332 = shalt.err (!%p329_p11)
}
  0x54   :  { %63 = dma.hbm_to_vmem [thread:$0]  %s478_s4, 16, %s61_s15, [#allocation9]  }
  0x55   :  { %355 = dma.done.wait [#allocation3], 128  }
  0x56   :  { %356 = vsyncadd [#allocation3], 4294967168 }
  0x57   :  { %357 = dma.done.wait [#allocation6], 192  }
  0x58   :  { %358 = vsyncadd [#allocation6], 4294967104 }
  0x59   :  { %359 = dma.done.wait [#allocation9], 32  }
  0x5a   :  { %360 = vsyncadd [#allocation9], 4294967264  ;;  %v368_v0 = vmov 0.0   ;;  %vm369_vm0 = vmmov 0   ;;  %v370_v1 = vmov 0   ;;  %vm99_vm1 = vcmask 1043456  }
  0x5b   :  { %206 = vmatprep.subr.mxu0 %v368_v0  ;;  %208 = vmatprep.mubr.msk.f32.mxu0 %vm369_vm0, %v368_v0  ;;  %vm95_vm2 = vcmask 31744   ;;  %v80_v2 = vld [vmem:[#allocation7] sm:$0xf]  ;;  %v79_v3 = vld [vmem:[#allocation2] sm:$0xff]  ;;  %v81_v4 = vld [vmem:[#allocation5] sm:$0xff]  ;;  %s371_s4 = smov [#allocation11]  }
  0x5c   :  { %220 = vset.pattern.permute.xlu0 %v370_v1  ;;  %207 = vmatpush3.msk.msra.mxu0 %vm99_vm1, %v80_v2  ;;  %v200_v5 = vld [vmem:[#allocation8] ss:$0 sm:$0xff]  ;;  %v203_v9 = vld [vmem:[#allocation10] ss:$0 sm:$0xff]  ;;  %s189_s26 = sshll.u32 %s371_s4, 4  ;;  %s190_s26 = int_to_ptr.vmem [resolvable:$true] %s189_s26 }
  0x5d   :  { %85 = vperm.xlu0 %220, %v81_v4   ;;  %209 = vmatmul.mubr.msk.f32.vlgmr.msra.gmra.mrb[0].mxu0 %vm95_vm2, %v79_v3  ;;  %s333_s27 = scalar_lea.vmem %s190_s26, 128  ;;  %p338_p13 = scmp.lt.s32.totalorder %s190_s26, %s190_s26 }
  0x5e   :  { %p334_p12 = scmp.ne.s32.totalorder %s190_s26, %s333_s27  ;;  %p339_p0 = scmp.lt.s32.totalorder %s333_s27, %s333_s27 }
  0x60   :  { %p340_p1 = por %p339_p0, %p338_p13 }
  0x62   :  { %p341_p2 = pnand %p340_p1, %p334_p12 }
  0xdc   :  { %v86_v6 = vpop.permute.xlu0 %85 }
  0xdd   :  { %v94_v7 = vmul.f32 %v200_v5, %v86_v6 }
 0x130   :  { %v169_v8 = vpop.f32.mrb[0].mxu0 }
 0x131   :  { %v170_v10 = vadd.f32 %v169_v8, %v94_v7  ;;  %v210_v11 = vpop.f32.mrb[1].mxu0 }
 0x133   :  { %v180_v12 = vadd.f32 %v203_v9, %v170_v10 }
 0x135   :  { %221 = vtanh.f32 %v180_v12 }
 0x13f   :  { %v222_v13 = vpop.eup %221 }
 0x140   :  { %182 = vst [vmem:[#allocation11] sm:$0xff] %v222_v13 }
 0x141   :  { %344 = shalt.err (!%p341_p2)
}
 0x142   :  { %s345_s21 = scalar_lea.hbm %s479_s5, 128 }
 0x143   :  { %p346_p3 = scmp.ne.s32.totalorder %s479_s5, %s345_s21  ;;  %p349_p4 = scmp.lt.u32.totalorder %s345_s21, %s479_s5 }
 0x145   :  { %p351_p5 = pnand %p349_p4, %p346_p3 }
 0x147   :  { %354 = shalt.err (!%p351_p5)
}
 0x148   :  { %192 = dma.vmem_to_hbm [thread:$0]  %s190_s26, 128, %s479_s5, [#allocation4]  }
 0x149   :  { %361 = dma.done.wait [#allocation4], 128  }
 0x14a   :  { %362 = vsyncadd [#allocation4], 4294967168 }
 0x14b   :  { %196 = vsyncpa [#allocation3], 1 }
 0x14c   :  { %197 = vsyncpa [#allocation6], 1 }
 0x14d   :  { %198 = vsyncpa [#allocation9], 1 }
 0x14e   :  { %199 = vsyncpa [#allocation4], 1 }

</bundles_post_ra>
